<compile_context>
chip_gen: v5e
topology: v5e:2x2
jax: 0.10.0
libtpu: 0.0.40
codegen_flags: <defaults>
</compile_context>

<pallas_src>
import jax
import jax.numpy as jnp
from jax.experimental import pallas as pl
from jax.experimental.pallas import tpu as pltpu


def _flatten_copy_kernel(x_ref, o_ref):
    # Identity copy of one (row_tile, LANES) slab.
    o_ref[...] = x_ref[...]


def _round_up(a: int, b: int) -> int:
    return ((a + b - 1) // b) * b


def flatten(x: jax.Array) -> jax.Array:
    """Pallas equivalent of `x.reshape((bs, -1))`."""
    bs = x.shape[0]
    n = 1
    for d in x.shape[1:]:
        n *= d
    total = bs * n
    dtype = x.dtype
    itemsize = jnp.dtype(dtype).itemsize

    # Sublane multiple per dtype packing (f32:8, bf16/f16:16, int8/fp8:32).
    if itemsize >= 4:
        sub = 8
    elif itemsize == 2:
        sub = 16
    else:
        sub = 32

    # Lane width: large multiple of 128 for lane-dense, unmasked stores;
    # fall back to 128 lanes for tiny inputs so we don't over-pad.
    lanes = 512 if total >= 512 * sub else 128

    # Row-major flatten is metadata-only; present the whole tensor as a
    # lane-dense 2D slab (rows, lanes) so every vreg is fully utilized.
    rows = -(-total // lanes)

    # Row tile: multiple of `sub`, block capped at ~2 MiB.  With input+output
    # each double-buffered the VMEM footprint is ~4x block (<= 8 MiB), which
    # fits the default scoped VMEM on v5e (16 MiB), v6e (32 MiB) and v7x
    # (32 MiB of 64 MiB physical) without raising vmem_limit_bytes.
    max_block_bytes = 2 * 1024 * 1024
    max_rows_per_tile = max(sub, (max_block_bytes // (lanes * itemsize)) // sub * sub)
    row_tile = min(max_rows_per_tile, _round_up(rows, sub))

    # Ensure >= 2 grid iterations when there is enough work, so the parallel
    # grid axis can be sharded across v7x's 2 TensorCores.
    if _round_up(rows, row_tile) // row_tile < 2 and rows > sub:
        row_tile = max(sub, _round_up(-(-rows // 2), sub))

    padded_rows = _round_up(rows, row_tile)
    padded_total = padded_rows * lanes
    grid = (padded_rows // row_tile,)

    # Metadata-only flatten; pad only if the total isn't tile-aligned.
    x_flat = x.reshape(-1)
    if padded_total != total:
        x_flat = jnp.pad(x_flat, (0, padded_total - total))
    slab = x_flat.reshape(padded_rows, lanes)

    out_slab = pl.pallas_call(
        _flatten_copy_kernel,
        out_shape=jax.ShapeDtypeStruct((padded_rows, lanes), dtype),
        grid=grid,
        in_specs=[pl.BlockSpec((row_tile, lanes), lambda i: (i, 0))],
        out_specs=pl.BlockSpec((row_tile, lanes), lambda i: (i, 0)),
        compiler_params=pltpu.CompilerParams(
            dimension_semantics=("parallel",)
        ),
    )(slab)

    # Strip padding and restore the (bs, n) view (metadata / cheap slice).
    out = out_slab.reshape(-1)
    if padded_total != total:
        out = out[:total]
    return out.reshape(bs, n)


if __name__ == "__main__":
    key = jax.random.PRNGKey(0)
    # Small NCHW input consistent with a conv feature map: B=2, C=4, H=W=16.
    x = jax.random.normal(key, (2, 4, 16, 16), dtype=jnp.float32)

    out = flatten(x)
    out = jax.block_until_ready(out)

    # Reference semantics: torch _in.reshape((bs, -1))
    expected = x.reshape(x.shape[0], -1)
    assert out.shape == expected.shape, (out.shape, expected.shape)
    assert out.dtype == expected.dtype
    assert bool(jnp.array_equal(out, expected))

    print("KERNEL_OK")
</pallas_src>

<mosaic_0001>
module attributes {stable_mosaic.version = 11 : i64} {
  func.func @_flatten_copy_kernel(%arg0: i32, %arg1: memref<8x128xf32, #tpu.memory_space<vmem>>, %arg2: memref<8x128xf32, #tpu.memory_space<vmem>>) attributes {dimension_semantics = [#tpu.dimension_semantics<parallel>], iteration_bounds = array<i64: 2>, scalar_prefetch = 0 : i64, scratch_operands = 0 : i64, tpu.core_type = #tpu.core_type<tc>, window_params = [{transform_indices = @transform_0, window_bounds = array<i64: 8, 128>}, {transform_indices = @transform_1, window_bounds = array<i64: 8, 128>}]} {
    %c0 = arith.constant 0 : index
    %c0_0 = arith.constant 0 : index
    %0 = vector.load %arg1[%c0, %c0_0] : memref<8x128xf32, #tpu.memory_space<vmem>>, vector<8x128xf32>
    %c0_1 = arith.constant 0 : index
    %c0_2 = arith.constant 0 : index
    %1 = vector.load %arg2[%c0_1, %c0_2] : memref<8x128xf32, #tpu.memory_space<vmem>>, vector<8x128xf32>
    tpu.vector_store %arg2[%c0_1, %c0_2], %0 {strides = array<i32>} : memref<8x128xf32, #tpu.memory_space<vmem>>, vector<8x128xf32>,
    return
  }
  func.func @transform_0(%arg0: i32) -> (i32, i32) {
    %c0_i32 = arith.constant 0 : i32
    %c0_i32_0 = arith.constant 0 : i32
    return %arg0, %c0_i32 : i32, i32
  }
  func.func @transform_1(%arg0: i32) -> (i32, i32) {
    %c0_i32 = arith.constant 0 : i32
    %c0_i32_0 = arith.constant 0 : i32
    return %arg0, %c0_i32 : i32, i32
  }
}

</mosaic_0001>

<bundles_post_ra>
// kernel: tpu_custom_call.1
= control target key start
LH: loop header
LB: loop body
LE: loop exit
PB: predicated region body
PF: predicated region fallthrough
CT: control target
= control target key end

     0   :  { %6 = vsyncpa [#allocation3], 0  ;;  %s515_s0 = inlined_call_operand.hbm [shape: f32[16,128], index: 0, kind: input, shape index: {}]   ;;  %s516_s1 = inlined_call_operand.hbm [shape: f32[16,128], index: 1, kind: output, shape index: {}]  }
   0x1   :  { %8 = vsyncpa [#allocation3 + $0x1], 0 }
   0x2   :  { %9 = vsyncpa [#allocation4], 0 }
   0x3   :  { %11 = vsyncpa [#allocation4 + $0x1], 0  ;;  %s388_s6 = smov 0   ;;  %s390_s7 = smov 0  }
   0x4   :  { %s392_s8 = smov 0   ;;  %s394_s9 = smov 0  }
   0x5 LB: > { %s409_s10 = sadd.s32 4294967295, %s376_s9   ;;  %s222_s11 = sadd.s32 4294967294, %s376_s9   ;;  %s376_s9 = sphi %s394_s9, %s526_s9   ;;  %s372_s8 = sphi %s392_s8, %s525_s8   ;;  %s368_s7 = sphi %s390_s7, %s524_s7   ;;  %s364_s6 = sphi %s388_s6, %s523_s6  }
   0x6   : > { %s413_s12 = sadd.s32 1, %s376_s9   ;;  %s24_s13 = sadd.s32 1, %s372_s8 }
   0x7   : > { %s21_s14 = ssub.s32 %s376_s9, %s413_s12  ;;  %p31_p0 = scmp.ne.s32.totalorder %s372_s8, %s368_s7 }
   0x8   : > { %p22_p1 = scmp.eq.s32.totalorder %s21_s14, 0  ;;  %p32_p2 = scmp.eq.s32.totalorder %s376_s9, 0 }
   0x9   : > { %p37_p3 = scmp.ne.s32.totalorder %s368_s7, %s364_s6  ;;  %p38_p4 = scmp.eq.s32.totalorder %s409_s10, 0 }
   0xa   : > { %s425_s15 = scalar_select %p22_p1, %s372_s8, %s24_s13  }
   0xb   : > { %p427_p5 = por %p32_p2, %p31_p0  ;;  %p431_p6 = por %p38_p4, %p37_p3 }
   0xc   : > { %p61_p7 = scmp.eq.s32.totalorder %s409_s10, 1  ;;  %p67_p8 = scmp.eq.s32.totalorder %s222_s11, 1 }
   0xd   : > { %p246_p10 = scmp.lt.s32.totalorder %s376_s9, 2  ;;  %s87_s20 = sand.u32 1, %s372_s8  }
   0xe   : > { %p438_p11 = por %p61_p7, %p31_p0  ;;  %p442_p12 = por %p67_p8, %p37_p3 }
   0xf   : > { %s226_s21 = sshll.u32 %s376_s9, 3  ;;  %s225_s22 = sshll.u32 %s87_s20, 3 }
  0x10   : > { %s95_s25 = scalar_lea.hbm %s515_s0, %s226_s21  ;;  %s91_s27 = scalar_lea.vmem [#allocation2], %s225_s22 }
  0x11   : > { %s97_s26 = sshll.u32 %s95_s25, 4  ;;  %s99_s28 = sshll.u32 %s91_s27, 4  ;;  %s98_s26 = int_to_ptr.hbm [resolvable:$true] %s97_s26  ;;  %s100_s28 = int_to_ptr.vmem [resolvable:$true] %s99_s28 }
  0x12   : > { %p453_p13 = pnand %p246_p10, %p427_p5  ;;  %p227_p0 = scmp.ge.s32.totalorder %s376_s9, 1 }
  0x13   : > { %p104_p1 = scmp.lt.s32.totalorder %s376_s9, 3  ;;  %s88_s30 = scalar_lea.sflag [#allocation3], %s87_s20 }
  0x14   : > { %s280_s2 = sshra.s32 %s98_s26, 4  ;;  %p284_p3 = pneg %p453_p13  ;;  %s281_s2 = int_to_ptr.hbm [resolvable:$true] %s280_s2 }
  0x15   : > { %s282_s3 = scalar_lea.hbm %s281_s2, 8  ;;  %s287_s11 = scalar_lea.hbm %s515_s0, 16 }
  0x16   : > { %p283_p2 = scmp.ne.s32.totalorder %s281_s2, %s282_s3  ;;  %p288_p5 = scmp.lt.s32.totalorder %s281_s2, %s515_s0 }
  0x17   : > { %p289_p8 = scmp.lt.s32.totalorder %s287_s11, %s282_s3 }
  0x18   : > { %p285_p4 = pnand %p284_p3, %p283_p2 }
  0x19   : > { %p290_p10 = por %p289_p8, %p288_p5 }
  0x1a   : > { %p286_p7 = pneg %p285_p4 }
  0x1c   : > { %p291_p9 = pnand %p290_p10, %p286_p7 }
  0x1e   : > { %294 = shalt.err (!%p291_p9)
}
  0x1f   : > { %241 = dma.hbm_to_vmem [thread:$0]  (!%p453_p13), %s98_s26, 128, %s100_s28, %s88_s30  }
  0x20   : > { %p105_p2 = pnand %p227_p0, %p104_p1 }
  0x21   : > { %s474_s16 = sand.u32 (!%p105_p2), 1, %s368_s7  }
  0x22   : > { %108 = sbr.rel (%p105_p2) target bundleno = 55 (0x37), region = 24  ;;  %s228_s20 = sshll.u32 (!%p105_p2), %s474_s16, 3 }
  0x23   : > { %s111_s21 = scalar_lea.sflag (!%p105_p2), [#allocation3], %s474_s16  ;;  %s114_s22 = scalar_lea.vmem (!%p105_p2), [#allocation2], %s228_s20 }
  0x27   : > { %355 = dma.done.wait (%p431_p6), %s111_s21, 128  }
  0x28   : > { %357 = vsyncadd (%p431_p6), %s111_s21, 4294967168  ;;  %s231_s23 = sshll.u32 %s409_s10, 3  ;;  %s133_s27 = scalar_lea.vmem [#allocation5], %s228_s20  ;;  %v134_v0 = vld [vmem:[%s114_s22] sm:$0xff] }
  0x29   : > { %s147_s26 = scalar_lea.hbm %s516_s1, %s231_s23  ;;  %s149_s28 = sshll.u32 %s133_s27, 4  ;;  %135 = vst [vmem:[%s133_s27] sm:$0xff] %v134_v0  ;;  %s150_s28 = int_to_ptr.vmem [resolvable:$true] %s149_s28 }
  0x2a   : > { %s151_s29 = sshll.u32 %s147_s26, 4  ;;  %s137_s30 = scalar_lea.sflag [#allocation4], %s474_s16  ;;  %s152_s29 = int_to_ptr.hbm [resolvable:$true] %s151_s29 }
  0x2b   : > { %s324_s2 = sshra.s32 %s152_s29, 4  ;;  %s330_s4 = scalar_lea.hbm %s516_s1, 16  ;;  %s325_s2 = int_to_ptr.hbm [resolvable:$true] %s324_s2 }
  0x2c   : > { %s326_s17 = scalar_lea.hbm %s325_s2, 8  ;;  %p331_p0 = scmp.lt.s32.totalorder %s325_s2, %s516_s1 }
  0x2d   : > { %p327_p6 = scmp.ne.s32.totalorder %s325_s2, %s326_s17  ;;  %p332_p1 = scmp.lt.s32.totalorder %s330_s4, %s326_s17 }
  0x2f   : > { %p328_p9 = pnand %p327_p6, %p438_p11  ;;  %p333_p3 = por %p332_p1, %p331_p0 }
  0x31   : > { %p329_p13 = pneg %p328_p9 }
  0x33   : > { %p334_p4 = pnand %p333_p3, %p329_p13 }
  0x35   : > { %337 = shalt.err (!%p334_p4)
}
  0x36   : > { %236 = dma.vmem_to_hbm [thread:$0]  (%p438_p11), %s150_s28, 128, %s152_s29, %s137_s30  }
  0x37 PF: > { %s163_s13 = sand.u32 1, %s364_s6   ;;  %p522_p7 = scmp.ge.s32.totalorder %s376_s9, 2 }
  0x38   : > { %s164_s14 = scalar_lea.sflag [#allocation4], %s163_s13 }
  0x39   : > { %p243_p5 = pnand %p522_p7, %p442_p12 }
  0x3b   : > { %p244_p8 = pneg %p243_p5 }
  0x3d   : > { %359 = dma.done.wait (%p244_p8), %s164_s14, 128  }
  0x3e   : > { %361 = vsyncadd (%p244_p8), %s164_s14, 4294967168  ;;  %p14_p10 = scmp.ge.s32.totalorder %s413_s12, 4   ;;  %s523_s6 = smov %s368_s7 }
  0x3f   : > { %s524_s7 = smov %s372_s8  ;;  %s525_s8 = smov %s425_s15 }
  0x40   : > { %s526_s9 = smov %s413_s12  ;;  %16 = sbr.rel (!%p14_p10) target bundleno = 5 (0x5), region = 69 }
  0x45   :  { %170 = vsyncpa [#allocation3], 1 }
  0x46   :  { %172 = vsyncpa [#allocation3 + $0x1], 1 }
  0x47   :  { %173 = vsyncpa [#allocation4], 1 }
  0x48   :  { %175 = vsyncpa [#allocation4 + $0x1], 1 }

</bundles_post_ra>
